<compile_context>
chip_gen: v6e
topology: v6e:2x2x1
jax: 0.10.0
libtpu: 0.0.40
codegen_flags: <defaults>
</compile_context>

<pallas_src>
import functools
import math

import jax
import jax.numpy as jnp
from jax.experimental import pallas as pl
from jax.experimental.pallas import tpu as pltpu

DELTA = 0.5
_C = 0.5 * math.log(2.0 * math.pi)

# Exact (division) by default.  Flip to True on v7x only after validating the
# ~2^-12 approx EUP reciprocal against the required tolerance.
_APPROX_RECIP = False


def _round_up(x, m):
    return ((x + m - 1) // m) * m


def _device_kind():
    try:
        return jax.devices()[0].device_kind.lower()
    except Exception:  # pragma: no cover - CPU / interpret fallbacks
        return ""


def _choose_tile_rows(n_rows, n_cols, itemsize, target_bytes, vmem_cap):
    rows = max(16, target_bytes // max(1, n_cols * itemsize))
    rows = max(16, (rows // 16) * 16)          # multiple of 16: valid f32 & bf16 tiles
    rows = min(rows, _round_up(n_rows, 16))    # no point tiling past (padded) row count
    # Clamp so 3 inputs x 2 pipeline buffers + f32 accumulator fit the VMEM budget.
    bytes_per_row = n_cols * (3 * 2 * itemsize + 4)
    budget = max(16 * bytes_per_row, vmem_cap - (4 << 20))
    max_rows = max(16, (budget // bytes_per_row) // 16 * 16)
    # TODO(synk): if 16 rows x n_cols still exceeds the budget (n_cols in the
    # hundreds of thousands with a non-128-divisible element count), a second
    # lane-axis grid dimension over columns would be required.
    return int(min(rows, max_rows))


def _huber_nll_kernel(mu_ref, sigma_ref, y_ref, out_ref, acc_ref, *,
                      tile_rows, n_rows, num_inner, grid_rows,
                      mask_needed, approx_recip):
    c = pl.program_id(0)   # "parallel" axis (2-way core split on v7x, size 1 elsewhere)
    j = pl.program_id(1)   # "arbitrary" reduction axis over row tiles

    @pl.when(j == 0)
    def _():
        acc_ref[...] = jnp.zeros_like(acc_ref)

    mu = mu_ref[...].astype(jnp.float32)
    sg = sigma_ref[...].astype(jnp.float32)
    y = y_ref[...].astype(jnp.float32)

    # huber_loss(mu, y, reduction='none', delta=DELTA) without compare+select:
    #   m = min(|d|, delta);  huber = m * (|d| - 0.5*m)
    diff = mu - y
    absd = jnp.abs(diff)
    m = jnp.minimum(absd, DELTA)
    huber = m * (absd - 0.5 * m)

    if approx_recip:
        inv_sg = pl.reciprocal(sg, approx=True)
    else:
        inv_sg = 1.0 / sg
    # nll without the per-element constant _C (added once in the wrapper).
    nll = jnp.log(sg) + 0.5 * huber * inv_sg

    if mask_needed:
        block = c * num_inner + j  # un-clamped linear block index
        is_edge = block >= grid_rows - 1  # tail (possibly partial) or redundant block

        @pl.when(jnp.logical_not(is_edge))
        def _():
            acc_ref[...] += nll  # interior tiles: pure VPU add, no mask work

        @pl.when(is_edge)
        def _():
            row = block * tile_rows + jax.lax.broadcasted_iota(jnp.int32, nll.shape, 0)
            acc_ref[...] += jnp.where(row < n_rows, nll, 0.0)
    else:
        acc_ref[...] += nll

    @pl.when(j == num_inner - 1)
    def _():
        total = jnp.sum(acc_ref[...])  # single cross-lane reduce per core
        out_ref[...] = jnp.broadcast_to(total, out_ref.shape).astype(out_ref.dtype)


def huber_nll_loss_mean(mu, sigma, y):
    """Pallas implementation of HuberNLLLoss(delta=0.5, reduction='mean')."""
    assert mu.shape == sigma.shape == y.shape
    n_total = int(mu.size)
    assert n_total > 0

    # Lane-dense view: the loss is elementwise + global mean, so a contiguous
    # (copy-free) flatten to (-1, W) with W a multiple of 128 is always valid.
    W = None
    for cand in (2048, 1024, 512, 256, 128):
        if n_total % cand == 0 and n_total // cand >= 8:
            W = cand
            break
    if W is not None:
        mu2, sg2, y2 = (t.reshape(n_total // W, W) for t in (mu, sigma, y))
    else:
        last = mu.shape[-1] if mu.ndim >= 1 and mu.shape[-1] > 0 else 1
        mu2, sg2, y2 = (t.reshape(-1, last) for t in (mu, sigma, y))
    B, D = mu2.shape

    # Generation-aware sizing.
    kind = _device_kind()
    is_v7 = ("v7" in kind) or ("7x" in kind)
    if is_v7:
        target_tile_bytes = 5 << 20   # per input; ~3.2 TB/s HBM -> amortize step overhead
        vmem_cap = 52 << 20           # stay inside the 64 MiB per-TC VMEM
    else:
        target_tile_bytes = 6 << 20   # v5e/v6e: 128 MiB VMEM, DMA dominates anyway
        vmem_cap = 88 << 20

    itemsize = mu2.dtype.itemsize
    tile_rows = _choose_tile_rows(B, D, itemsize, target_tile_bytes, vmem_cap)
    grid_rows = pl.cdiv(B, tile_rows)

    # 2-way core split only where it helps (v7x has 2 TensorCores per chip);
    # on single-TC v5e/v6e it would just add redundant clamped tile reads.
    num_cores = 2 if (is_v7 and grid_rows >= 2) else 1
    num_inner = pl.cdiv(grid_rows, num_cores)

    # Masking is only compiled in when a partial tail tile or a redundant
    # (clamped) block can actually occur.
    mask_needed = (B % tile_rows != 0) or (num_cores * num_inner > grid_rows)

    def in_map(c, j):
        # Clamp so redundant / tail blocks still read in-bounds data;
        # the kernel masks their contribution to exactly zero.
        return (jnp.minimum(c * num_inner + j, grid_rows - 1), 0)

    kernel = functools.partial(
        _huber_nll_kernel,
        tile_rows=tile_rows, n_rows=B, num_inner=num_inner, grid_rows=grid_rows,
        mask_needed=mask_needed, approx_recip=_APPROX_RECIP,
    )

    # 3 inputs x 2 pipeline buffers + f32 accumulator tile + headroom.
    tile_in_bytes = tile_rows * D * itemsize
    acc_bytes = tile_rows * D * 4
    need = 3 * 2 * tile_in_bytes + acc_bytes + (4 << 20)
    vmem_bytes = int(min(max(need, 16 << 20), vmem_cap))

    out = pl.pallas_call(
        kernel,
        out_shape=jax.ShapeDtypeStruct((num_cores, 8, 128), jnp.float32),
        grid_spec=pltpu.PrefetchScalarGridSpec(
            num_scalar_prefetch=0,
            grid=(num_cores, num_inner),
            in_specs=[
                pl.BlockSpec((tile_rows, D), in_map),
                pl.BlockSpec((tile_rows, D), in_map),
                pl.BlockSpec((tile_rows, D), in_map),
            ],
            out_specs=pl.BlockSpec((1, 8, 128), lambda c, j: (c, 0, 0)),
            scratch_shapes=[pltpu.VMEM((tile_rows, D), jnp.float32)],
        ),
        compiler_params=pltpu.CompilerParams(
            dimension_semantics=("parallel", "arbitrary"),
            vmem_limit_bytes=vmem_bytes,
        ),
    )(mu2, sg2, y2)

    # Each core broadcast its partial sum over its (8,128) slab; take one lane each.
    total = jnp.sum(out[:, 0, 0])
    return total / float(n_total) + _C


def _reference(mu, sigma, y):
    mu = mu.astype(jnp.float32)
    sigma = sigma.astype(jnp.float32)
    y = y.astype(jnp.float32)
    diff = mu - y
    absd = jnp.abs(diff)
    huber = jnp.where(absd <= DELTA, 0.5 * diff * diff, DELTA * (absd - 0.5 * DELTA))
    nll = jnp.log(sigma) + _C + 0.5 * huber / sigma
    return jnp.mean(nll)


if __name__ == "__main__":
    key = jax.random.PRNGKey(0)
    k1, k2, k3 = jax.random.split(key, 3)

    # TODO(synk): reduction='batch' and reduction=None variants not exposed;
    # the default 'mean' reduction is implemented in-kernel.

    # Primary check (f32, aligned shapes; exercises the lane-dense flatten path).
    B, D = 16, 256
    mu = jax.random.normal(k1, (B, D), dtype=jnp.float32)
    y = jax.random.normal(k2, (B, D), dtype=jnp.float32)
    sigma = jax.nn.softplus(jax.random.normal(k3, (B, D), dtype=jnp.float32)) + 1e-3
    out = jax.block_until_ready(huber_nll_loss_mean(mu, sigma, y))
    ref = _reference(mu, sigma, y)
    assert jnp.allclose(out, ref, rtol=1e-5, atol=1e-5), (out, ref)

    # Ragged row count + element count not a multiple of 128 (cdiv grid + mask path).
    B2, D2 = 50, 200
    mu2 = jax.random.normal(k1, (B2, D2), dtype=jnp.float32)
    y2 = jax.random.normal(k2, (B2, D2), dtype=jnp.float32)
    sigma2 = jax.nn.softplus(jax.random.normal(k3, (B2, D2), dtype=jnp.float32)) + 1e-3
    out2 = jax.block_until_ready(huber_nll_loss_mean(mu2, sigma2, y2))
    ref2 = _reference(mu2, sigma2, y2)
    assert jnp.allclose(out2, ref2, rtol=1e-5, atol=1e-4), (out2, ref2)

    # bf16 inputs (half the HBM traffic); f32 math inside the kernel.
    B3, D3 = 32, 256
    mu3 = jax.random.normal(k1, (B3, D3), dtype=jnp.bfloat16)
    y3 = jax.random.normal(k2, (B3, D3), dtype=jnp.bfloat16)
    sigma3 = (jax.nn.softplus(jax.random.normal(k3, (B3, D3), dtype=jnp.float32)) + 1e-1
              ).astype(jnp.bfloat16)
    out3 = jax.block_until_ready(huber_nll_loss_mean(mu3, sigma3, y3))
    ref3 = _reference(mu3, sigma3, y3)
    assert jnp.allclose(out3, ref3, rtol=1e-5, atol=1e-4), (out3, ref3)

    # 3-D input (batch, seq, hidden) exercising the ndim != 2 fallback reshape.
    B4, S4, H4 = 2, 8, 32
    mu4 = jax.random.normal(k1, (B4, S4, H4), dtype=jnp.float32)
    y4 = jax.random.normal(k2, (B4, S4, H4), dtype=jnp.float32)
    sigma4 = jax.nn.softplus(jax.random.normal(k3, (B4, S4, H4), dtype=jnp.float32)) + 1e-3
    out4 = jax.block_until_ready(huber_nll_loss_mean(mu4, sigma4, y4))
    ref4 = _reference(mu4, sigma4, y4)
    assert jnp.allclose(out4, ref4, rtol=1e-5, atol=1e-5), (out4, ref4)

    print("KERNEL_OK")
</pallas_src>

<mosaic_0001>
module attributes {stable_mosaic.version = 11 : i64} {
  func.func @_huber_nll_kernel(%arg0: i32, %arg1: i32, %arg2: memref<16x512xf32, #tpu.memory_space<vmem>>, %arg3: memref<16x512xf32, #tpu.memory_space<vmem>>, %arg4: memref<16x512xf32, #tpu.memory_space<vmem>>, %arg5: memref<1x8x128xf32, #tpu.memory_space<vmem>>, %arg6: memref<16x512xf32, #tpu.memory_space<vmem>>) attributes {dimension_semantics = [#tpu.dimension_semantics<parallel>, #tpu.dimension_semantics<arbitrary>], iteration_bounds = array<i64: 1, 1>, scalar_prefetch = 0 : i64, scratch_operands = 1 : i64, tpu.core_type = #tpu.core_type<tc>, window_params = [{transform_indices = @transform_0, window_bounds = array<i64: 16, 512>}, {transform_indices = @transform_1, window_bounds = array<i64: 16, 512>}, {transform_indices = @transform_2, window_bounds = array<i64: 16, 512>}, {transform_indices = @transform_3, window_bounds = array<i64: 1, 8, 128>}]} {
    %c0_i32 = arith.constant 0 : i32
    %0 = arith.cmpi eq, %arg1, %c0_i32 : i32
    %1 = arith.extui %0 : i1 to i32
    %c0_i32_0 = arith.constant 0 : i32
    %2 = arith.cmpi ne, %1, %c0_i32_0 : i32
    scf.if %2 {
      %cst_14 = arith.constant 0.000000e+00 : f32
      %32 = vector.broadcast %cst_14 : f32 to vector<16x512xf32>
      %c0_15 = arith.constant 0 : index
      %c0_16 = arith.constant 0 : index
      %33 = vector.load %arg6[%c0_15, %c0_16] : memref<16x512xf32, #tpu.memory_space<vmem>>, vector<16x512xf32>
      tpu.vector_store %arg6[%c0_15, %c0_16], %32 {strides = array<i32>} : memref<16x512xf32, #tpu.memory_space<vmem>>, vector<16x512xf32>,
    } else {
    }
    %c0 = arith.constant 0 : index
    %c0_1 = arith.constant 0 : index
    %3 = vector.load %arg2[%c0, %c0_1] : memref<16x512xf32, #tpu.memory_space<vmem>>, vector<16x512xf32>
    %c0_2 = arith.constant 0 : index
    %c0_3 = arith.constant 0 : index
    %4 = vector.load %arg3[%c0_2, %c0_3] : memref<16x512xf32, #tpu.memory_space<vmem>>, vector<16x512xf32>
    %c0_4 = arith.constant 0 : index
    %c0_5 = arith.constant 0 : index
    %5 = vector.load %arg4[%c0_4, %c0_5] : memref<16x512xf32, #tpu.memory_space<vmem>>, vector<16x512xf32>
    %6 = arith.subf %3, %5 : vector<16x512xf32>
    %7 = math.absf %6 : vector<16x512xf32>
    %cst = arith.constant 5.000000e-01 : f32
    %8 = vector.broadcast %cst : f32 to vector<16x512xf32>
    %9 = arith.minimumf %7, %8 : vector<16x512xf32>
    %cst_6 = arith.constant 5.000000e-01 : f32
    %10 = vector.broadcast %cst_6 : f32 to vector<16x512xf32>
    %11 = arith.mulf %10, %9 : vector<16x512xf32>
    %12 = arith.subf %7, %11 : vector<16x512xf32>
    %13 = arith.mulf %9, %12 : vector<16x512xf32>
    %cst_7 = arith.constant 1.000000e+00 : f32
    %14 = vector.broadcast %cst_7 : f32 to vector<16x512xf32>
    %15 = arith.divf %14, %4 : vector<16x512xf32>
    %16 = math.log %4 : vector<16x512xf32>
    %cst_8 = arith.constant 5.000000e-01 : f32
    %17 = vector.broadcast %cst_8 : f32 to vector<16x512xf32>
    %18 = arith.mulf %17, %13 : vector<16x512xf32>
    %19 = arith.mulf %18, %15 : vector<16x512xf32>
    %20 = arith.addf %16, %19 : vector<16x512xf32>
    %c1_i32 = arith.constant 1 : i32
    %21 = arith.muli %arg0, %c1_i32 : i32
    %22 = arith.addi %21, %arg1 : i32
    %c0_i32_9 = arith.constant 0 : i32
    %23 = arith.cmpi sge, %22, %c0_i32_9 : i32
    %true = arith.constant true
    %24 = arith.xori %23, %true : i1
    %25 = arith.extui %24 : i1 to i32
    %c0_i32_10 = arith.constant 0 : i32
    %26 = arith.cmpi ne, %25, %c0_i32_10 : i32
    scf.if %26 {
      %c0_14 = arith.constant 0 : index
      %c0_15 = arith.constant 0 : index
      %32 = vector.load %arg6[%c0_14, %c0_15] : memref<16x512xf32, #tpu.memory_space<vmem>>, vector<16x512xf32>
      %33 = arith.addf %32, %20 : vector<16x512xf32>
      %c0_16 = arith.constant 0 : index
      %c0_17 = arith.constant 0 : index
      %34 = vector.load %arg6[%c0_16, %c0_17] : memref<16x512xf32, #tpu.memory_space<vmem>>, vector<16x512xf32>
      tpu.vector_store %arg6[%c0_16, %c0_17], %33 {strides = array<i32>} : memref<16x512xf32, #tpu.memory_space<vmem>>, vector<16x512xf32>,
    } else {
    }
    %27 = arith.extui %23 : i1 to i32
    %c0_i32_11 = arith.constant 0 : i32
    %28 = arith.cmpi ne, %27, %c0_i32_11 : i32
    scf.if %28 {
      %c16_i32 = arith.constant 16 : i32
      %32 = arith.muli %22, %c16_i32 : i32
      %33 = tpu.iota {dimensions = array<i32: 0>} : vector<16x512xi32>
      %34 = vector.broadcast %32 : i32 to vector<16x512xi32>
      %35 = arith.addi %34, %33 : vector<16x512xi32>
      %c0_14 = arith.constant 0 : index
      %c0_15 = arith.constant 0 : index
      %36 = vector.load %arg6[%c0_14, %c0_15] : memref<16x512xf32, #tpu.memory_space<vmem>>, vector<16x512xf32>
      %c8_i32 = arith.constant 8 : i32
      %37 = vector.broadcast %c8_i32 : i32 to vector<16x512xi32>
      %38 = arith.cmpi slt, %35, %37 : vector<16x512xi32>
      %cst_16 = arith.constant 0.000000e+00 : f32
      %39 = vector.broadcast %cst_16 : f32 to vector<16x512xf32>
      %40 = arith.select %38, %20, %39 : vector<16x512xi1>, vector<16x512xf32>
      %41 = arith.addf %36, %40 : vector<16x512xf32>
      %c0_17 = arith.constant 0 : index
      %c0_18 = arith.constant 0 : index
      %42 = vector.load %arg6[%c0_17, %c0_18] : memref<16x512xf32, #tpu.memory_space<vmem>>, vector<16x512xf32>
      tpu.vector_store %arg6[%c0_17, %c0_18], %41 {strides = array<i32>} : memref<16x512xf32, #tpu.memory_space<vmem>>, vector<16x512xf32>,
    } else {
    }
    %c0_i32_12 = arith.constant 0 : i32
    %29 = arith.cmpi eq, %arg1, %c0_i32_12 : i32
    %30 = arith.extui %29 : i1 to i32
    %c0_i32_13 = arith.constant 0 : i32
    %31 = arith.cmpi ne, %30, %c0_i32_13 : i32
    scf.if %31 {
      %c0_14 = arith.constant 0 : index
      %c0_15 = arith.constant 0 : index
      %32 = vector.load %arg6[%c0_14, %c0_15] : memref<16x512xf32, #tpu.memory_space<vmem>>, vector<16x512xf32>
      %33 = vector.shape_cast %32 : vector<16x512xf32> to vector<1x16x512xf32>
      %cst_16 = arith.constant dense<0.000000e+00> : vector<1xf32>
      %34 = vector.multi_reduction <add>, %33, %cst_16 [1, 2] : vector<1x16x512xf32> to vector<1xf32>
      %35 = vector.shape_cast %34 : vector<1xf32> to vector<1x1x1xf32>
      %36 = vector.extract %35[0, 0, 0] : f32 from vector<1x1x1xf32>
      %37 = vector.broadcast %36 : f32 to vector<1x8x128xf32>
      %c0_17 = arith.constant 0 : index
      %c0_18 = arith.constant 0 : index
      %c0_19 = arith.constant 0 : index
      %38 = vector.load %arg5[%c0_17, %c0_18, %c0_19] : memref<1x8x128xf32, #tpu.memory_space<vmem>>, vector<1x8x128xf32>
      tpu.vector_store %arg5[%c0_17, %c0_18, %c0_19], %37 {strides = array<i32>} : memref<1x8x128xf32, #tpu.memory_space<vmem>>, vector<1x8x128xf32>,
    } else {
    }
    return
  }
  func.func @transform_0(%arg0: i32, %arg1: i32) -> (i32, i32) {
    %c1_i32 = arith.constant 1 : i32
    %0 = arith.muli %arg0, %c1_i32 : i32
    %1 = arith.addi %0, %arg1 : i32
    %c0_i32 = arith.constant 0 : i32
    %2 = arith.minsi %1, %c0_i32 : i32
    %c0_i32_0 = arith.constant 0 : i32
    %c0_i32_1 = arith.constant 0 : i32
    return %2, %c0_i32_0 : i32, i32
  }
  func.func @transform_1(%arg0: i32, %arg1: i32) -> (i32, i32) {
    %c1_i32 = arith.constant 1 : i32
    %0 = arith.muli %arg0, %c1_i32 : i32
    %1 = arith.addi %0, %arg1 : i32
    %c0_i32 = arith.constant 0 : i32
    %2 = arith.minsi %1, %c0_i32 : i32
    %c0_i32_0 = arith.constant 0 : i32
    %c0_i32_1 = arith.constant 0 : i32
    return %2, %c0_i32_0 : i32, i32
  }
  func.func @transform_2(%arg0: i32, %arg1: i32) -> (i32, i32) {
    %c1_i32 = arith.constant 1 : i32
    %0 = arith.muli %arg0, %c1_i32 : i32
    %1 = arith.addi %0, %arg1 : i32
    %c0_i32 = arith.constant 0 : i32
    %2 = arith.minsi %1, %c0_i32 : i32
    %c0_i32_0 = arith.constant 0 : i32
    %c0_i32_1 = arith.constant 0 : i32
    return %2, %c0_i32_0 : i32, i32
  }
  func.func @transform_3(%arg0: i32, %arg1: i32) -> (i32, i32, i32) {
    %c0_i32 = arith.constant 0 : i32
    %c0_i32_0 = arith.constant 0 : i32
    %c0_i32_1 = arith.constant 0 : i32
    return %arg0, %c0_i32, %c0_i32_0 : i32, i32, i32
  }
}

</mosaic_0001>

<bundles_post_ra>
// kernel: tpu_custom_call.1
= control target key start
LH: loop header
LB: loop body
LE: loop exit
PB: predicated region body
PF: predicated region fallthrough
CT: control target
= control target key end

     0   :  { %8 = vsyncpa [#allocation4], 0  ;;  %s535_s0 = inlined_call_operand.hbm [shape: f32[8,512], index: 0, kind: input, shape index: {}]   ;;  %s536_s1 = inlined_call_operand.hbm [shape: f32[8,512], index: 1, kind: input, shape index: {}]   ;;  %s537_s2 = inlined_call_operand.hbm [shape: f32[8,512], index: 2, kind: input, shape index: {}]   ;;  %s538_s3 = inlined_call_operand.hbm [shape: f32[1,8,128], index: 3, kind: output, shape index: {}]  }
   0x1   :  { %9 = vsyncpa [#allocation7], 0 }
   0x2   :  { %10 = vsyncpa [#allocation5], 0 }
   0x3   :  { %22 = vsyncadd [#allocation4], 512  ;;  %s488_s12 = smov [#allocation3]  }
   0x4   :  { %s28_s13 = sshll.u32 %s488_s12, 4  ;;  %s29_s13 = int_to_ptr.vmem [resolvable:$true] %s28_s13 }
   0x5   :  { %s410_s14 = scalar_lea.vmem %s29_s13, 512  ;;  %s414_s15 = scalar_lea.vmem %s29_s13, 1024 }
   0x6   :  { %p411_p0 = scmp.ne.s32.totalorder %s29_s13, %s410_s14  ;;  %p415_p1 = scmp.lt.s32.totalorder %s29_s13, %s29_s13 }
   0x7   :  { %p416_p2 = scmp.lt.s32.totalorder %s414_s15, %s410_s14 }
   0x9   :  { %p417_p3 = por %p416_p2, %p415_p1 }
   0xb   :  { %p418_p4 = pnand %p417_p3, %p411_p0 }
   0xd   :  { %421 = shalt.err (!%p418_p4)
}
   0xe   :  { %s489_s16 = smov 512   ;;  %s490_s17 = smov 32  }
   0xf   :  { %34 = dma.hbm_to_vmem [thread:$0]  %s535_s0, 512, %s29_s13, [#allocation4], %s489_s16, %s489_s16, %s490_s17  }
  0x10   :  { %46 = vsyncadd [#allocation7], 512  ;;  %s491_s20 = smov [#allocation6]  }
  0x11   :  { %s52_s21 = sshll.u32 %s491_s20, 4  ;;  %s53_s21 = int_to_ptr.vmem [resolvable:$true] %s52_s21 }
  0x12   :  { %s430_s22 = scalar_lea.vmem %s53_s21, 512  ;;  %s434_s23 = scalar_lea.vmem %s53_s21, 1024 }
  0x13   :  { %p431_p5 = scmp.ne.s32.totalorder %s53_s21, %s430_s22  ;;  %p435_p6 = scmp.lt.s32.totalorder %s53_s21, %s53_s21 }
  0x14   :  { %p436_p7 = scmp.lt.s32.totalorder %s434_s23, %s430_s22 }
  0x16   :  { %p437_p8 = por %p436_p7, %p435_p6 }
  0x18   :  { %p438_p9 = pnand %p437_p8, %p431_p5 }
  0x1a   :  { %441 = shalt.err (!%p438_p9)
}
  0x1b   :  { %58 = dma.hbm_to_vmem [thread:$0]  %s536_s1, 512, %s53_s21, [#allocation7], %s489_s16, %s489_s16, %s490_s17  }
  0x1c   :  { %70 = vsyncadd [#allocation7], 512  ;;  %s492_s0 = smov [#allocation8]  }
  0x1d   :  { %s76_s26 = sshll.u32 %s492_s0, 4  ;;  %s77_s26 = int_to_ptr.vmem [resolvable:$true] %s76_s26 }
  0x1e   :  { %s450_s27 = scalar_lea.vmem %s77_s26, 512  ;;  %s454_s28 = scalar_lea.vmem %s77_s26, 1024 }
  0x1f   :  { %p451_p10 = scmp.ne.s32.totalorder %s77_s26, %s450_s27  ;;  %p455_p11 = scmp.lt.s32.totalorder %s77_s26, %s77_s26 }
  0x20   :  { %p456_p12 = scmp.lt.s32.totalorder %s454_s28, %s450_s27 }
  0x22   :  { %p457_p13 = por %p456_p12, %p455_p11 }
  0x24   :  { %p458_p0 = pnand %p457_p13, %p451_p10 }
  0x26   :  { %461 = shalt.err (!%p458_p0)
}
  0x27   :  { %82 = dma.hbm_to_vmem [thread:$0]  %s537_s2, 512, %s77_s26, [#allocation7], %s489_s16, %s489_s16, %s490_s17  }
  0x28   :  { %482 = dma.done.wait [#allocation4], 1024  }
  0x29   :  { %483 = vsyncadd [#allocation4], 4294966272 }
  0x2a   :  { %484 = dma.done.wait [#allocation7], 2048  }
  0x2b   :  { %485 = vsyncadd [#allocation7], 4294965248  ;;  %v125_v0 = vld [vmem:[#allocation3] sm:$0xff]  ;;  %v126_v1 = vld [vmem:[#allocation3 + $0x8] sm:$0xff]  ;;  %s493_s1 = smov [#allocation9]  }
  0x2c   :  { %v127_v2 = vld [vmem:[#allocation3 + $0x10] sm:$0xff]  ;;  %v128_v3 = vld [vmem:[#allocation3 + $0x18] sm:$0xff]  ;;  %v133_v4 = vld [vmem:[#allocation6] sm:$0xff]  ;;  %s362_s2 = sshll.u32 %s493_s1, 4  ;;  %s363_s2 = int_to_ptr.vmem [resolvable:$true] %s362_s2 }
  0x2d   :  { %v134_v5 = vld [vmem:[#allocation6 + $0x8] sm:$0xff]  ;;  %v135_v6 = vld [vmem:[#allocation6 + $0x10] sm:$0xff]  ;;  %v136_v7 = vld [vmem:[#allocation6 + $0x18] sm:$0xff]  ;;  %386 = vrcp.f32 %v133_v4  ;;  %s462_s5 = scalar_lea.vmem %s363_s2, 128  ;;  %p467_p2 = scmp.lt.s32.totalorder %s363_s2, %s363_s2 }
  0x2e   :  { %v141_v8 = vld [vmem:[#allocation8] sm:$0xff]  ;;  %v142_v9 = vld [vmem:[#allocation8 + $0x8] sm:$0xff]  ;;  %v143_v10 = vld [vmem:[#allocation8 + $0x10] sm:$0xff]  ;;  %388 = vrcp.f32 %v134_v5  ;;  %p463_p1 = scmp.ne.s32.totalorder %s363_s2, %s462_s5  ;;  %p468_p3 = scmp.lt.s32.totalorder %s462_s5, %s462_s5 }
  0x2f   :  { %v144_v11 = vld [vmem:[#allocation8 + $0x18] sm:$0xff]  ;;  %v149_v12 = vsub.f32 %v125_v0, %v141_v8  ;;  %v150_v13 = vsub.f32 %v126_v1, %v142_v9  ;;  %v151_v14 = vsub.f32 %v127_v2, %v143_v10  ;;  %390 = vrcp.f32 %v135_v6 }
  0x30   :  { %v152_v15 = vsub.f32 %v128_v3, %v144_v11  ;;  %392 = vrcp.f32 %v136_v7  ;;  %p469_p4 = por %p468_p3, %p467_p2 }
  0x31   :  { %v157_v16 = vand.u32 2147483647, %v149_v12  ;;  %v158_v17 = vand.u32 2147483647, %v150_v13  ;;  %v159_v18 = vand.u32 2147483647, %v151_v14  ;;  %394 = vlog2.f32 %v133_v4 }
  0x32   :  { %v160_v19 = vand.u32 2147483647, %v152_v15  ;;  %396 = vlog2.f32 %v134_v5  ;;  %p470_p5 = pnand %p469_p4, %p463_p1 }
  0x33   :  { %v165_v20 = vmin.f32 %v157_v16, 0.5  ;;  %v166_v21 = vmin.f32 %v158_v17, 0.5  ;;  %v167_v22 = vmin.f32 %v159_v18, 0.5  ;;  %398 = vlog2.f32 %v135_v6 }
  0x34   :  { %v168_v23 = vmin.f32 %v160_v19, 0.5  ;;  %400 = vlog2.f32 %v136_v7 }
  0x35   :  { %v173_v24 = vmul.f32 0.5, %v165_v20  ;;  %v174_v25 = vmul.f32 0.5, %v166_v21  ;;  %v175_v26 = vmul.f32 0.5, %v167_v22 }
  0x36   :  { %v176_v27 = vmul.f32 0.5, %v168_v23 }
  0x37   :  { %v181_v28 = vsub.f32 %v157_v16, %v173_v24  ;;  %v182_v29 = vsub.f32 %v158_v17, %v174_v25  ;;  %v183_v30 = vsub.f32 %v159_v18, %v175_v26 }
  0x38   :  { %v184_v31 = vsub.f32 %v160_v19, %v176_v27 }
  0x39   :  { %v189_v32 = vmul.f32 %v181_v28, %v165_v20  ;;  %v190_v33 = vmul.f32 %v182_v29, %v166_v21  ;;  %v191_v34 = vmul.f32 %v183_v30, %v167_v22 }
  0x3a   :  { %v192_v35 = vmul.f32 %v184_v31, %v168_v23  ;;  %v387_v36 = vpop.eup %386 }
  0x3b   :  { %v229_v37 = vmul.f32 0.5, %v189_v32  ;;  %v389_v38 = vpop.eup %388  ;;  %v230_v39 = vmul.f32 0.5, %v190_v33  ;;  %v231_v40 = vmul.f32 0.5, %v191_v34 }
  0x3c   :  { %v391_v41 = vpop.eup %390  ;;  %v232_v42 = vmul.f32 0.5, %v192_v35 }
  0x3d   :  { %v393_v43 = vpop.eup %392  ;;  %v237_v44 = vmul.f32 %v387_v36, %v229_v37  ;;  %v238_v46 = vmul.f32 %v389_v38, %v230_v39  ;;  %v239_v49 = vmul.f32 %v391_v41, %v231_v40 }
  0x3e   :  { %v395_v45 = vpop.eup %394  ;;  %v240_v52 = vmul.f32 %v393_v43, %v232_v42 }
  0x3f   :  { %v397_v47 = vpop.eup %396  ;;  %v214_v48 = vmul.f32 0.6931472, %v395_v45 }
  0x40   :  { %v399_v50 = vpop.eup %398  ;;  %v216_v51 = vmul.f32 0.6931472, %v397_v47 }
  0x41   :  { %v401_v53 = vpop.eup %400  ;;  %v218_v54 = vmul.f32 0.6931472, %v399_v50  ;;  %v245_v55 = vadd.f32 %v237_v44, %v214_v48 }
  0x42   :  { %v220_v56 = vmul.f32 0.6931472, %v401_v53  ;;  %v246_v57 = vadd.f32 %v238_v46, %v216_v51 }
  0x43   :  { %v247_v58 = vadd.f32 %v239_v49, %v218_v54 }
  0x44   :  { %v248_v59 = vadd.f32 %v240_v52, %v220_v56  ;;  %v338_v60 = vadd.f32 %v246_v57, %v245_v55 }
  0x46   :  { %v339_v61 = vadd.f32 %v338_v60, %v247_v58 }
  0x48   :  { %v340_v62 = vadd.f32 %v339_v61, %v248_v59 }
  0x4a   :  { %345 = vadd.xlane.f32.xlu0 %v340_v62 }
  0xd3   :  { %v346_v63 = vpop.xlane.xlu0 %345 }
  0xd4   :  { %v347_v0 = vrot.slane %v346_v63, 4 }
  0xd6   :  { %v348_v1 = vadd.f32 %v347_v0, %v346_v63 }
  0xd8   :  { %v349_v2 = vrot.slane %v348_v1, 2 }
  0xda   :  { %v350_v3 = vadd.f32 %v349_v2, %v348_v1 }
  0xdc   :  { %v351_v4 = vrot.slane %v350_v3, 1 }
  0xde   :  { %v352_v5 = vadd.f32 %v351_v4, %v350_v3 }
  0xe0   :  { %378 = vpush %v352_v5 }
 0x111   :  { %s379_s4 = spop %378 }
 0x112   :  { %v354_v6 = vstv %s379_s4 }
 0x113   :  { %355 = vst [vmem:[#allocation9] sm:$0xff] %v354_v6 }
 0x114   :  { %473 = shalt.err (!%p470_p5)
}
 0x115   :  { %365 = dma.vmem_to_hbm [thread:$0]  %s363_s2, 128, %s538_s3, [#allocation5]  }
 0x116   :  { %486 = dma.done.wait [#allocation5], 128  }
 0x117   :  { %487 = vsyncadd [#allocation5], 4294967168 }
 0x118   :  { %369 = vsyncpa [#allocation4], 1 }
 0x119   :  { %370 = vsyncpa [#allocation7], 1 }
 0x11a   :  { %371 = vsyncpa [#allocation5], 1 }

</bundles_post_ra>
